<compile_context>
chip_gen: v7x
topology: tpu7x:2x2x1
jax: 0.10.0
libtpu: 0.0.40
codegen_flags: <defaults>
</compile_context>

<pallas_src>
import functools
import math

import numpy as np
import jax
import jax.numpy as jnp
from jax.experimental import pallas as pl
from jax.experimental.pallas import tpu as pltpu


def convnext_like_kernel(x_ref, dwp_ref, pw_ref, out_ref, *, H, W, approx_gelu):
    """One batch-tile per grid step. Slab layout (rows = bt*C, HW): lane-dense, >=8 sublanes.

    x_ref   : (R, HW)   input rows (batch-tile x channels, flattened spatial on lanes)
    dwp_ref : (R, 11)   [ BN-folded dw taps (9) | BN-folded dw bias | pw bias ]
    pw_ref  : (R, R)    block-diagonal 1x1-conv weight (I_bt kron Wpw), lane-aligned
    out_ref : (R, HW)
    """
    R, HW = x_ref.shape
    x = x_ref[...].astype(jnp.float32)                       # (R, HW) lane-dense
    dwp = dwp_ref[...].astype(jnp.float32)                   # (R, 11)
    wpw = pw_ref[...].astype(jnp.float32)                    # (R, R)

    # ---- boundary masks generated in-kernel (iota + compares), no (9,HW) HBM input ----
    lane = jax.lax.broadcasted_iota(jnp.int32, (R, HW), 1)
    col = (lane & (W - 1)) if (W & (W - 1)) == 0 else (lane % W)
    left_ok = col >= 1                       # source column w-1 exists
    right_ok = col <= W - 2                  # source column w+1 exists
    up_ok = lane >= W                        # source row h-1 exists
    down_ok = lane < (H - 1) * W             # source row h+1 exists

    # ---- depthwise 3x3 'same' via separable roll+mask (4 rolls instead of 8) ----
    # Column-shifted, column-masked copies: xc_dw[p] = x[p+dw] * [w+dw valid]
    x_l = jnp.where(left_ok, pltpu.roll(x, shift=1, axis=1), 0.0)        # dw = -1
    x_r = jnp.where(right_ok, pltpu.roll(x, shift=HW - 1, axis=1), 0.0)  # dw = +1

    def tap(t):                              # per-row (channel) weight, lane-broadcast
        return dwp[:, t:t + 1]

    acc = None
    for kh, dh in enumerate((-1, 0, 1)):
        # Weight the three column taps of this kernel row first (roll commutes with the
        # per-row scaling), then a single row-roll + row-mask for the whole group.
        t = x_l * tap(3 * kh) + x * tap(3 * kh + 1) + x_r * tap(3 * kh + 2)
        if dh != 0:
            t = pltpu.roll(t, shift=(-dh * W) % HW, axis=1)
            t = jnp.where(up_ok if dh == -1 else down_ok, t, 0.0)
        acc = t if acc is None else acc + t
    acc = acc + dwp[:, 9:10]                 # BN-folded depthwise bias

    # ---- GELU ----
    if approx_gelu:
        k = 0.7978845608028654               # sqrt(2/pi); tanh lands on the EUP slot
        y = 0.5 * acc * (1.0 + jnp.tanh(k * (acc + 0.044715 * acc * acc * acc)))
    else:
        y = 0.5 * acc * (1.0 + jax.lax.erf(acc * (1.0 / math.sqrt(2.0))))

    # ---- pointwise 1x1 conv on the MXU (block-diag weight handles the batch tile) ----
    z = jnp.dot(wpw, y, preferred_element_type=jnp.float32) + dwp[:, 10:11]

    # ---- residual ----
    out_ref[...] = (x + z).astype(out_ref.dtype)


def _fold_and_pack_params(params, bt):
    """Fold inference BN into the depthwise conv (f32) and build the per-block params."""
    C = params["bdw"].shape[0]
    scale = params["gamma"] / jnp.sqrt(params["var"] + 1e-5)                  # (C,)
    wdw = params["wdw_torch"].reshape(C, 9) * scale[:, None]                  # (C, 9)
    bdw = (params["bdw"] - params["mean"]) * scale + params["beta"]           # (C,)
    dwp = jnp.concatenate([wdw, bdw[:, None], params["bpw"][:, None]], axis=1)
    dwp = jnp.tile(dwp, (bt, 1)).astype(jnp.float32)                          # (bt*C, 11)
    pwbd = jnp.kron(jnp.eye(bt, dtype=jnp.float32),
                    params["wpw"].astype(jnp.float32))                        # (bt*C, bt*C)
    return dwp, pwbd


def conv_block2d_forward(x_nchw, params, *, approx_gelu=True):
    """ConvNeXtLikeBlock forward. Input/output are NCHW (PyTorch convention)."""
    B, C, H, W = x_nchw.shape
    HW = H * W
    # NOTE: roll-based 'same' padding relies on the lane extent matching logical HW;
    # HW here (256) is a multiple of 128, so no pad lanes are rotated into valid positions.

    # Batch tile: smallest divisor of B giving >= 8 useful sublanes per block.
    bt = B
    for cand in range(1, B + 1):
        if B % cand == 0 and cand * C >= 8:
            bt = cand
            break
    R = bt * C

    x_flat = x_nchw.reshape(B * C, HW)          # contiguous reshape: no HBM round trip
    dwp, pwbd = _fold_and_pack_params(params, bt)

    kernel = functools.partial(convnext_like_kernel, H=H, W=W, approx_gelu=approx_gelu)
    out = pl.pallas_call(
        kernel,
        out_shape=jax.ShapeDtypeStruct((B * C, HW), x_nchw.dtype),
        grid=(B // bt,),
        in_specs=[
            pl.BlockSpec((R, HW), lambda i: (i, 0)),
            pl.BlockSpec((R, 11), lambda i: (0, 0)),
            pl.BlockSpec((R, R), lambda i: (0, 0)),
        ],
        out_specs=pl.BlockSpec((R, HW), lambda i: (i, 0)),
        compiler_params=pltpu.CompilerParams(
            dimension_semantics=("parallel",),
            vmem_limit_bytes=32 * 1024 * 1024),
    )(x_flat, dwp, pwbd)
    return out.reshape(B, C, H, W)


def reference_forward(x_nchw, params):
    """Pure-JAX (XLA) reference of the same forward pass (exact-erf GELU), NCHW."""
    B, C, H, W = x_nchw.shape
    y = jax.lax.conv_general_dilated(
        x_nchw, params["wdw_torch"], window_strides=(1, 1), padding="SAME",
        dimension_numbers=("NCHW", "OIHW", "NCHW"), feature_group_count=C)
    y = y + params["bdw"].reshape(1, C, 1, 1)
    scale = params["gamma"] / jnp.sqrt(params["var"] + 1e-5)
    y = (y - params["mean"].reshape(1, C, 1, 1)) * scale.reshape(1, C, 1, 1) \
        + params["beta"].reshape(1, C, 1, 1)
    y = 0.5 * y * (1.0 + jax.lax.erf(y / math.sqrt(2.0)))
    z = jnp.einsum("bchw,oc->bohw", y, params["wpw"])
    z = z + params["bpw"].reshape(1, C, 1, 1)
    return x_nchw + z


def make_params(C, key):
    ks = jax.random.split(key, 8)
    wdw_torch = jax.random.normal(ks[0], (C, 1, 3, 3), jnp.float32) * 0.1
    return {
        "wdw_torch": wdw_torch,                                        # (C,1,3,3) PyTorch layout
        "bdw":   jax.random.normal(ks[1], (C,), jnp.float32) * 0.1,
        "gamma": 1.0 + 0.1 * jax.random.normal(ks[2], (C,), jnp.float32),
        "beta":  0.1 * jax.random.normal(ks[3], (C,), jnp.float32),
        "mean":  0.1 * jax.random.normal(ks[4], (C,), jnp.float32),
        "var":   0.5 + jnp.abs(jax.random.normal(ks[5], (C,), jnp.float32)) * 0.5,
        "wpw":   jax.random.normal(ks[6], (C, C), jnp.float32) * 0.2,  # (C_out, C_in)
        "bpw":   jax.random.normal(ks[7], (C,), jnp.float32) * 0.1,
    }


if __name__ == "__main__":
    key = jax.random.PRNGKey(0)
    k_x, k_p = jax.random.split(key)

    B, C, H, W = 2, 4, 16, 16            # (batch, channels, freq, time)
    x = jax.random.normal(k_x, (B, C, H, W), jnp.float32)
    params = make_params(C, k_p)

    out = jax.block_until_ready(conv_block2d_forward(x, params))
    ref = jax.block_until_ready(reference_forward(x, params))
    np.testing.assert_allclose(np.asarray(out), np.asarray(ref),
                               rtol=1e-3, atol=1e-3)
    print("KERNEL_OK")
</pallas_src>

<mosaic_0001>
module attributes {stable_mosaic.version = 11 : i64} {
  func.func @convnext_like_kernel(%arg0: i32, %arg1: memref<8x256xf32, #tpu.memory_space<vmem>>, %arg2: memref<8x11xf32, #tpu.memory_space<vmem>>, %arg3: memref<8x8xf32, #tpu.memory_space<vmem>>, %arg4: memref<8x256xf32, #tpu.memory_space<vmem>>) attributes {dimension_semantics = [#tpu.dimension_semantics<parallel>], iteration_bounds = array<i64: 1>, scalar_prefetch = 0 : i64, scratch_operands = 0 : i64, tpu.core_type = #tpu.core_type<tc>, window_params = [{transform_indices = @transform_0, window_bounds = array<i64: 8, 256>}, {pipeline_mode = #tpu.pipeline_mode<synchronous>, transform_indices = @transform_1, window_bounds = array<i64: 8, 11>}, {pipeline_mode = #tpu.pipeline_mode<synchronous>, transform_indices = @transform_2, window_bounds = array<i64: 8, 8>}, {transform_indices = @transform_3, window_bounds = array<i64: 8, 256>}]} {
    %c0 = arith.constant 0 : index
    %c0_0 = arith.constant 0 : index
    %0 = vector.load %arg1[%c0, %c0_0] : memref<8x256xf32, #tpu.memory_space<vmem>>, vector<8x256xf32>
    %c0_1 = arith.constant 0 : index
    %c0_2 = arith.constant 0 : index
    %1 = vector.load %arg2[%c0_1, %c0_2] : memref<8x11xf32, #tpu.memory_space<vmem>>, vector<8x11xf32>
    %c0_3 = arith.constant 0 : index
    %c0_4 = arith.constant 0 : index
    %2 = vector.load %arg3[%c0_3, %c0_4] : memref<8x8xf32, #tpu.memory_space<vmem>>, vector<8x8xf32>
    %3 = tpu.iota {dimensions = array<i32: 1>} : vector<8x256xi32>
    %c15_i32 = arith.constant 15 : i32
    %4 = vector.broadcast %c15_i32 : i32 to vector<8x256xi32>
    %5 = arith.andi %3, %4 : vector<8x256xi32>
    %c1_i32 = arith.constant 1 : i32
    %6 = vector.broadcast %c1_i32 : i32 to vector<8x256xi32>
    %7 = arith.cmpi sge, %5, %6 : vector<8x256xi32>
    %c14_i32 = arith.constant 14 : i32
    %8 = vector.broadcast %c14_i32 : i32 to vector<8x256xi32>
    %9 = arith.cmpi sle, %5, %8 : vector<8x256xi32>
    %c16_i32 = arith.constant 16 : i32
    %10 = vector.broadcast %c16_i32 : i32 to vector<8x256xi32>
    %11 = arith.cmpi sge, %3, %10 : vector<8x256xi32>
    %c240_i32 = arith.constant 240 : i32
    %12 = vector.broadcast %c240_i32 : i32 to vector<8x256xi32>
    %13 = arith.cmpi slt, %3, %12 : vector<8x256xi32>
    %c1_i32_5 = arith.constant 1 : i32
    %14 = tpu.dynamic_rotate %0 by %c1_i32_5 dim 1 : vector<8x256xf32>, i32 -> vector<8x256xf32>
    %cst = arith.constant 0.000000e+00 : f32
    %15 = vector.broadcast %cst : f32 to vector<8x256xf32>
    %16 = arith.select %7, %14, %15 : vector<8x256xi1>, vector<8x256xf32>
    %c255_i32 = arith.constant 255 : i32
    %17 = tpu.dynamic_rotate %0 by %c255_i32 dim 1 : vector<8x256xf32>, i32 -> vector<8x256xf32>
    %cst_6 = arith.constant 0.000000e+00 : f32
    %18 = vector.broadcast %cst_6 : f32 to vector<8x256xf32>
    %19 = arith.select %9, %17, %18 : vector<8x256xi1>, vector<8x256xf32>
    %20 = vector.extract_strided_slice %1 {offsets = [0, 0], sizes = [8, 1], strides = [1, 1]} : vector<8x11xf32> to vector<8x1xf32>
    %21 = vector.broadcast %20 : vector<8x1xf32> to vector<8x256xf32>
    %22 = arith.mulf %16, %21 : vector<8x256xf32>
    %23 = vector.extract_strided_slice %1 {offsets = [0, 1], sizes = [8, 1], strides = [1, 1]} : vector<8x11xf32> to vector<8x1xf32>
    %24 = vector.broadcast %23 : vector<8x1xf32> to vector<8x256xf32>
    %25 = arith.mulf %0, %24 : vector<8x256xf32>
    %26 = arith.addf %22, %25 : vector<8x256xf32>
    %27 = vector.extract_strided_slice %1 {offsets = [0, 2], sizes = [8, 1], strides = [1, 1]} : vector<8x11xf32> to vector<8x1xf32>
    %28 = vector.broadcast %27 : vector<8x1xf32> to vector<8x256xf32>
    %29 = arith.mulf %19, %28 : vector<8x256xf32>
    %30 = arith.addf %26, %29 : vector<8x256xf32>
    %c16_i32_7 = arith.constant 16 : i32
    %31 = tpu.dynamic_rotate %30 by %c16_i32_7 dim 1 : vector<8x256xf32>, i32 -> vector<8x256xf32>
    %cst_8 = arith.constant 0.000000e+00 : f32
    %32 = vector.broadcast %cst_8 : f32 to vector<8x256xf32>
    %33 = arith.select %11, %31, %32 : vector<8x256xi1>, vector<8x256xf32>
    %34 = vector.extract_strided_slice %1 {offsets = [0, 3], sizes = [8, 1], strides = [1, 1]} : vector<8x11xf32> to vector<8x1xf32>
    %35 = vector.broadcast %34 : vector<8x1xf32> to vector<8x256xf32>
    %36 = arith.mulf %16, %35 : vector<8x256xf32>
    %37 = vector.extract_strided_slice %1 {offsets = [0, 4], sizes = [8, 1], strides = [1, 1]} : vector<8x11xf32> to vector<8x1xf32>
    %38 = vector.broadcast %37 : vector<8x1xf32> to vector<8x256xf32>
    %39 = arith.mulf %0, %38 : vector<8x256xf32>
    %40 = arith.addf %36, %39 : vector<8x256xf32>
    %41 = vector.extract_strided_slice %1 {offsets = [0, 5], sizes = [8, 1], strides = [1, 1]} : vector<8x11xf32> to vector<8x1xf32>
    %42 = vector.broadcast %41 : vector<8x1xf32> to vector<8x256xf32>
    %43 = arith.mulf %19, %42 : vector<8x256xf32>
    %44 = arith.addf %40, %43 : vector<8x256xf32>
    %45 = arith.addf %33, %44 : vector<8x256xf32>
    %46 = vector.extract_strided_slice %1 {offsets = [0, 6], sizes = [8, 1], strides = [1, 1]} : vector<8x11xf32> to vector<8x1xf32>
    %47 = vector.broadcast %46 : vector<8x1xf32> to vector<8x256xf32>
    %48 = arith.mulf %16, %47 : vector<8x256xf32>
    %49 = vector.extract_strided_slice %1 {offsets = [0, 7], sizes = [8, 1], strides = [1, 1]} : vector<8x11xf32> to vector<8x1xf32>
    %50 = vector.broadcast %49 : vector<8x1xf32> to vector<8x256xf32>
    %51 = arith.mulf %0, %50 : vector<8x256xf32>
    %52 = arith.addf %48, %51 : vector<8x256xf32>
    %53 = vector.extract_strided_slice %1 {offsets = [0, 8], sizes = [8, 1], strides = [1, 1]} : vector<8x11xf32> to vector<8x1xf32>
    %54 = vector.broadcast %53 : vector<8x1xf32> to vector<8x256xf32>
    %55 = arith.mulf %19, %54 : vector<8x256xf32>
    %56 = arith.addf %52, %55 : vector<8x256xf32>
    %c240_i32_9 = arith.constant 240 : i32
    %57 = tpu.dynamic_rotate %56 by %c240_i32_9 dim 1 : vector<8x256xf32>, i32 -> vector<8x256xf32>
    %cst_10 = arith.constant 0.000000e+00 : f32
    %58 = vector.broadcast %cst_10 : f32 to vector<8x256xf32>
    %59 = arith.select %13, %57, %58 : vector<8x256xi1>, vector<8x256xf32>
    %60 = arith.addf %45, %59 : vector<8x256xf32>
    %61 = vector.extract_strided_slice %1 {offsets = [0, 9], sizes = [8, 1], strides = [1, 1]} : vector<8x11xf32> to vector<8x1xf32>
    %62 = vector.broadcast %61 : vector<8x1xf32> to vector<8x256xf32>
    %63 = arith.addf %60, %62 : vector<8x256xf32>
    %cst_11 = arith.constant 5.000000e-01 : f32
    %64 = vector.broadcast %cst_11 : f32 to vector<8x256xf32>
    %65 = arith.mulf %64, %63 : vector<8x256xf32>
    %cst_12 = arith.constant 4.471500e-02 : f32
    %66 = vector.broadcast %cst_12 : f32 to vector<8x256xf32>
    %67 = arith.mulf %66, %63 : vector<8x256xf32>
    %68 = arith.mulf %67, %63 : vector<8x256xf32>
    %69 = arith.mulf %68, %63 : vector<8x256xf32>
    %70 = arith.addf %63, %69 : vector<8x256xf32>
    %cst_13 = arith.constant 0.797884583 : f32
    %71 = vector.broadcast %cst_13 : f32 to vector<8x256xf32>
    %72 = arith.mulf %71, %70 : vector<8x256xf32>
    %73 = math.tanh %72 : vector<8x256xf32>
    %cst_14 = arith.constant 1.000000e+00 : f32
    %74 = vector.broadcast %cst_14 : f32 to vector<8x256xf32>
    %75 = arith.addf %74, %73 : vector<8x256xf32>
    %76 = arith.mulf %65, %75 : vector<8x256xf32>
    %cst_15 = arith.constant dense<0.000000e+00> : vector<8x256xf32>
    %77 = tpu.matmul %2, %76, %cst_15 {dimension_numbers = #tpu.dot_dimension_numbers<[1], [0], [0], [1], [0, 0, 1, 1], [], []>} : vector<8x8xf32>, vector<8x256xf32>, vector<8x256xf32> -> vector<8x256xf32>
    %78 = vector.extract_strided_slice %1 {offsets = [0, 10], sizes = [8, 1], strides = [1, 1]} : vector<8x11xf32> to vector<8x1xf32>
    %79 = vector.broadcast %78 : vector<8x1xf32> to vector<8x256xf32>
    %80 = arith.addf %77, %79 : vector<8x256xf32>
    %81 = arith.addf %0, %80 : vector<8x256xf32>
    %c0_16 = arith.constant 0 : index
    %c0_17 = arith.constant 0 : index
    %82 = vector.load %arg4[%c0_16, %c0_17] : memref<8x256xf32, #tpu.memory_space<vmem>>, vector<8x256xf32>
    tpu.vector_store %arg4[%c0_16, %c0_17], %81 {strides = array<i32>} : memref<8x256xf32, #tpu.memory_space<vmem>>, vector<8x256xf32>,
    return
  }
  func.func @transform_0(%arg0: i32) -> (i32, i32) {
    %c0_i32 = arith.constant 0 : i32
    %c0_i32_0 = arith.constant 0 : i32
    return %arg0, %c0_i32 : i32, i32
  }
  func.func @transform_1(%arg0: i32) -> (i32, i32) {
    %c0_i32 = arith.constant 0 : i32
    %c0_i32_0 = arith.constant 0 : i32
    %c0_i32_1 = arith.constant 0 : i32
    return %c0_i32, %c0_i32_0 : i32, i32
  }
  func.func @transform_2(%arg0: i32) -> (i32, i32) {
    %c0_i32 = arith.constant 0 : i32
    %c0_i32_0 = arith.constant 0 : i32
    %c0_i32_1 = arith.constant 0 : i32
    return %c0_i32, %c0_i32_0 : i32, i32
  }
  func.func @transform_3(%arg0: i32) -> (i32, i32) {
    %c0_i32 = arith.constant 0 : i32
    %c0_i32_0 = arith.constant 0 : i32
    return %arg0, %c0_i32 : i32, i32
  }
}

</mosaic_0001>

<bundles_post_ra>
// kernel: tpu_custom_call.1
= control target key start
LH: loop header
LB: loop body
LE: loop exit
PB: predicated region body
PF: predicated region fallthrough
CT: control target
= control target key end

     0   :  { %8 = vsyncpa [#allocation3], 0  ;;  %s557_s0 = inlined_call_operand.hbm [shape: f32[8,256], index: 0, kind: input, shape index: {}]   ;;  %s558_s1 = inlined_call_operand.hbm [shape: f32[8,11], index: 1, kind: input, shape index: {}]   ;;  %s559_s2 = inlined_call_operand.hbm [shape: f32[8,8], index: 2, kind: input, shape index: {}]   ;;  %s560_s3 = inlined_call_operand.hbm [shape: f32[8,256], index: 3, kind: output, shape index: {}]  }
   0x1   :  { %9 = vsyncpa [#allocation6], 0 }
   0x2   :  { %10 = vsyncpa [#allocation4], 0  ;;  %s427_s12 = smov [#allocation5]   ;;  %s428_s14 = smov [#allocation2]  }
   0x3   :  { %s27_s13 = sshll.u32 %s427_s12, 4  ;;  %s17_s15 = sshll.u32 %s428_s14, 4  ;;  %s28_s13 = int_to_ptr.vmem [resolvable:$true] %s27_s13  ;;  %s18_s15 = int_to_ptr.vmem [resolvable:$true] %s17_s15 }
   0x4   :  { %s333_s18 = scalar_lea.hbm %s558_s1, 128 }
   0x5   :  { %p334_p0 = scmp.ne.s32.totalorder %s558_s1, %s333_s18  ;;  %p337_p1 = scmp.lt.u32.totalorder %s333_s18, %s558_s1 }
   0x7   :  { %p339_p2 = pnand %p337_p1, %p334_p0 }
   0x9   :  { %342 = shalt.err (!%p339_p2)
}
   0xa   :  { %s343_s23 = scalar_lea.vmem %s28_s13, 128  ;;  %p348_p4 = scmp.lt.s32.totalorder %s28_s13, %s28_s13 }
   0xb   :  { %p344_p3 = scmp.ne.s32.totalorder %s28_s13, %s343_s23  ;;  %p349_p5 = scmp.lt.s32.totalorder %s343_s23, %s343_s23 }
   0xd   :  { %p350_p6 = por %p349_p5, %p348_p4 }
   0xf   :  { %p351_p7 = pnand %p350_p6, %p344_p3 }
  0x11   :  { %354 = shalt.err (!%p351_p7)
}
  0x12   :  { %30 = dma.hbm_to_vmem [thread:$0]  %s558_s1, 128, %s28_s13, [#allocation6]  }
  0x13   :  { %s355_s28 = scalar_lea.hbm %s557_s0, 256 }
  0x14   :  { %p356_p8 = scmp.ne.s32.totalorder %s557_s0, %s355_s28  ;;  %p359_p9 = scmp.lt.u32.totalorder %s355_s28, %s557_s0 }
  0x16   :  { %p361_p10 = pnand %p359_p9, %p356_p8 }
  0x18   :  { %364 = shalt.err (!%p361_p10)
}
  0x19   :  { %s365_s6 = scalar_lea.vmem %s18_s15, 256  ;;  %p370_p12 = scmp.lt.s32.totalorder %s18_s15, %s18_s15 }
  0x1a   :  { %p366_p11 = scmp.ne.s32.totalorder %s18_s15, %s365_s6  ;;  %p371_p13 = scmp.lt.s32.totalorder %s365_s6, %s365_s6 }
  0x1c   :  { %p372_p0 = por %p371_p13, %p370_p12 }
  0x1e   :  { %p373_p1 = pnand %p372_p0, %p366_p11 }
  0x20   :  { %376 = shalt.err (!%p373_p1)
}
  0x21   :  { %20 = dma.hbm_to_vmem [thread:$0]  %s557_s0, 256, %s18_s15, [#allocation3]  }
  0x22   :  { %s429_s8 = smov [#allocation7]   ;;  %s377_s12 = scalar_lea.hbm %s559_s2, 128 }
  0x23   :  { %s37_s9 = sshll.u32 %s429_s8, 4  ;;  %p378_p2 = scmp.ne.s32.totalorder %s559_s2, %s377_s12  ;;  %s38_s9 = int_to_ptr.vmem [resolvable:$true] %s37_s9 }
  0x24   :  { %p381_p3 = scmp.lt.u32.totalorder %s377_s12, %s559_s2 }
  0x26   :  { %p383_p4 = pnand %p381_p3, %p378_p2 }
  0x28   :  { %386 = shalt.err (!%p383_p4)
}
  0x29   :  { %s387_s18 = scalar_lea.vmem %s38_s9, 128  ;;  %p392_p6 = scmp.lt.s32.totalorder %s38_s9, %s38_s9 }
  0x2a   :  { %p388_p5 = scmp.ne.s32.totalorder %s38_s9, %s387_s18  ;;  %p393_p7 = scmp.lt.s32.totalorder %s387_s18, %s387_s18 }
  0x2c   :  { %p394_p8 = por %p393_p7, %p392_p6 }
  0x2e   :  { %p395_p9 = pnand %p394_p8, %p388_p5 }
  0x30   :  { %398 = shalt.err (!%p395_p9)
}
  0x31   :  { %40 = dma.hbm_to_vmem [thread:$0]  %s559_s2, 128, %s38_s9, [#allocation6]  }
  0x32   :  { %421 = dma.done.wait [#allocation3], 256  }
  0x33   :  { %422 = vsyncadd [#allocation3], 4294967040 }
  0x34   :  { %423 = dma.done.wait [#allocation6], 256  }
  0x35   :  { %424 = vsyncadd [#allocation6], 4294967040  ;;  %v430_v0 = vmov 6   ;;  %v431_v1 = vmov 0   ;;  %v503_v2 = vld [vmem:[#allocation5] sm:$0xff]  ;;  %v432_v3 = vmov 7   ;;  %v54_v14 = vlaneseq }
  0x36   :  { %320 = vset.pattern.permute.xlu1 %v430_v0  ;;  %318 = vset.pattern.permute.xlu0 %v431_v1  ;;  %v433_v4 = vmov 1   ;;  %v434_v5 = vmov 2   ;;  %v435_v6 = vmov 8   ;;  %v511_v7 = vld [vmem:[#allocation2] sm:$0xff]  ;;  %s436_s2 = smov 1   ;;  %s437_s19 = smov 127  }
  0x37   :  { %142 = vperm.xlu1 %320, %v503_v2   ;;  %87 = vperm.xlu0 %318, %v503_v2   ;;  %v515_v8 = vld [vmem:[#allocation2 + $0x8] sm:$0xff]  ;;  %v438_v9 = vmov 3   ;;  %v439_v10 = vmov 4   ;;  %v440_v11 = vmov 9   ;;  %v441_v12 = vmov 5   ;;  %s442_s20 = smov 112  }
  0x38   :  { %v523_v17 = vand.u32 127, %v54_v14  ;;  %s443_s21 = smov 16   ;;  %vm202_vm10 = vcmask 64512   ;;  %s446_s22 = smov [#allocation8]  }
  0x39   :  { %s287_s23 = sshll.u32 %s446_s22, 4  ;;  %s288_s23 = int_to_ptr.vmem [resolvable:$true] %s287_s23 }
  0x3a   :  { %v526_v20 = vadd.s32 128, %v523_v17  ;;  %v57_v21 = vand.u32 15, %v523_v17  ;;  %vm71_vm0 = vcmp.lt.s32.totalorder %v523_v17, 1  ;;  %vm80_vm4 = vcmp.lt.s32.totalorder %v523_v17, 127  ;;  %s399_s24 = scalar_lea.vmem %s288_s23, 256  ;;  %p404_p11 = scmp.lt.s32.totalorder %s288_s23, %s288_s23 }
  0x3b   :  { %321 = vset.pattern.permute.xlu1 %v432_v3  ;;  %319 = vset.pattern.permute.xlu0 %v433_v4  ;;  %vm112_vm6 = vcmp.lt.s32.totalorder %v523_v17, 16  ;;  %vm63_vm7 = vcmp.ge.s32.totalorder %v523_v17, 16  ;;  %vm167_vm8 = vcmp.lt.s32.totalorder %v523_v17, 112  ;;  %p400_p10 = scmp.ne.s32.totalorder %s288_s23, %s399_s24  ;;  %p405_p12 = scmp.lt.s32.totalorder %s399_s24, %s399_s24 }
  0x3c   :  { %148 = vperm.xlu1 %321, %v503_v2   ;;  %93 = vperm.xlu0 %319, %v503_v2   ;;  %v58_v23 = vand.u32 15, %v526_v20  ;;  %vm59_vm1 = vcmp.ge.s32.totalorder %v57_v21, 1  ;;  %vm61_vm3 = vcmp.le.s32.totalorder %v57_v21, 14  ;;  %vm66_vm9 = vcmp.lt.s32.totalorder %v526_v20, 240 }
  0x3d   :  { %p406_p13 = por %p405_p12, %p404_p11 }
  0x3e   :  { %vm60_vm2 = vcmp.ge.s32.totalorder %v58_v23, 1  ;;  %vm62_vm5 = vcmp.le.s32.totalorder %v58_v23, 14 }
  0x3f   :  { %p407_p0 = pnand %p406_p13, %p400_p10 }
  0x40   :  { %322 = vset.pattern.permute.xlu1 %v434_v5  ;;  %323 = vset.pattern.permute.xlu0 %v435_v6  ;;  %v444_v6 = vmov 0.0  }
  0x41   :  { %101 = vperm.xlu1 %322, %v503_v2   ;;  %156 = vperm.xlu0 %323, %v503_v2  }
  0x42   :  { %270 = vmatprep.mubr.f32.mxu0 %v444_v6 }
  0x45   :  { %67 = vrot.lane.b32.xlu1 %v511_v7, %s436_s2  ;;  %76 = vrot.lane.b32.xlu0 %v511_v7, %s437_s19 }
  0x46   :  { %324 = vset.pattern.permute.xlu0 %v438_v9  ;;  %325 = vset.pattern.permute.xlu1 %v439_v10  ;;  %v445_v9 = vmov 10  }
  0x49   :  { %69 = vrot.lane.b32.xlu1 %v515_v8, %s436_s2  ;;  %118 = vperm.xlu0 %324, %v503_v2  }
  0x4d   :  { %78 = vrot.lane.b32.xlu1 %v515_v8, %s437_s19  ;;  %327 = vset.pattern.permute.xlu0 %v440_v11 }
  0x4e   :  { %175 = vperm.xlu0 %327, %v503_v2  }
  0x51   :  { %124 = vperm.xlu1 %325, %v503_v2  }
  0x52   :  { %328 = vset.pattern.permute.xlu0 %v445_v9 }
  0x55   :  { %326 = vset.pattern.permute.xlu1 %v441_v12 }
  0x56   :  { %132 = vperm.xlu1 %326, %v503_v2  }
  0xb6   :  { %v143_v13 = vpop.permute.xlu1 %142  ;;  %v88_v15 = vpop.permute.xlu0 %87 }
  0xbb   :  { %v149_v16 = vpop.permute.xlu1 %148  ;;  %v94_v18 = vpop.permute.xlu0 %93 }
  0xbc   :  { %v151_v34 = vmul.f32 %v149_v16, %v511_v7  ;;  %v96_v35 = vmul.f32 %v94_v18, %v511_v7  ;;  %v97_v46 = vmul.f32 %v94_v18, %v515_v8  ;;  %v152_v57 = vmul.f32 %v149_v16, %v515_v8 }
  0xc0   :  { %v102_v19 = vpop.permute.xlu1 %101  ;;  %v157_v24 = vpop.permute.xlu0 %156 }
  0xc4   :  { %v68_v22 = vpop.permute.xlu1 %67  ;;  %v77_v29 = vpop.permute.xlu0 %76 }
  0xc8   :  { %v70_v25 = vpop.permute.xlu1 %69  ;;  %v119_v47 = vpop.permute.xlu0 %118 }
  0xc9   :  { %v72_v26 = vsel %vm71_vm0, %v68_v22, %v70_v25  ;;  %v73_v27 = vsel %vm71_vm0, %v70_v25, %v68_v22 }
  0xca   :  { %v74_v28 = vsel %vm59_vm1, %v73_v27, 0.0  ;;  %v75_v30 = vsel %vm60_vm2, %v72_v26, 0.0 }
  0xcb   :  { %v90_v31 = vmul.f32 %v88_v15, %v74_v28  ;;  %v145_v32 = vmul.f32 %v143_v13, %v74_v28  ;;  %v91_v38 = vmul.f32 %v88_v15, %v75_v30  ;;  %v146_v53 = vmul.f32 %v143_v13, %v75_v30 }
  0xcc   :  { %v79_v33 = vpop.permute.xlu1 %78  ;;  %v121_v55 = vmul.f32 %v119_v47, %v74_v28  ;;  %v122_v56 = vmul.f32 %v119_v47, %v75_v30 }
  0xcd   :  { %v81_v36 = vsel %vm80_vm4, %v77_v29, %v79_v33  ;;  %v82_v37 = vsel %vm80_vm4, %v79_v33, %v77_v29  ;;  %v153_v43 = vadd.f32 %v151_v34, %v145_v32  ;;  %v98_v44 = vadd.f32 %v96_v35, %v90_v31  ;;  %v176_v11 = vpop.permute.xlu0 %175 }
  0xce   :  { %v83_v39 = vsel %vm61_vm3, %v81_v36, 0.0  ;;  %v84_v40 = vsel %vm62_vm5, %v82_v37, 0.0  ;;  %v99_v54 = vadd.f32 %v97_v46, %v91_v38  ;;  %v154_v1 = vadd.f32 %v152_v57, %v146_v53 }
  0xcf   :  { %v104_v41 = vmul.f32 %v102_v19, %v83_v39  ;;  %v159_v42 = vmul.f32 %v157_v24, %v83_v39  ;;  %v105_v48 = vmul.f32 %v102_v19, %v84_v40  ;;  %v160_v58 = vmul.f32 %v157_v24, %v84_v40 }
  0xd0   :  { %v125_v45 = vpop.permute.xlu1 %124 }
  0xd1   :  { %v161_v49 = vadd.f32 %v159_v42, %v153_v43  ;;  %v106_v50 = vadd.f32 %v104_v41, %v98_v44  ;;  %v127_v51 = vmul.f32 %v125_v45, %v511_v7  ;;  %v128_v52 = vmul.f32 %v125_v45, %v515_v8  ;;  %v53_v44 = vld [vmem:[#allocation7] sm:$0xff] }
  0xd2   :  { %v107_v60 = vadd.f32 %v105_v48, %v99_v54  ;;  %v162_v5 = vadd.f32 %v160_v58, %v154_v1 }
  0xd3   :  { %163 = vrot.lane.b32.xlu0 %v161_v49, %s442_s20  ;;  %108 = vrot.lane.b32.xlu1 %v106_v50, %s443_s21  ;;  %v129_v61 = vadd.f32 %v127_v51, %v121_v55  ;;  %v130_v62 = vadd.f32 %v128_v52, %v122_v56 }
  0xd5   :  { %v133_v59 = vpop.permute.xlu1 %132 }
  0xd6   :  { %v135_v63 = vmul.f32 %v133_v59, %v83_v39  ;;  %v136_v0 = vmul.f32 %v133_v59, %v84_v40 }
  0xd7   :  { %110 = vrot.lane.b32.xlu1 %v107_v60, %s443_s21  ;;  %199 = vperm.xlu0 %328, %v503_v2  }
  0xd8   :  { %v137_v3 = vadd.f32 %v135_v63, %v129_v61  ;;  %v138_v4 = vadd.f32 %v136_v0, %v130_v62 }
  0xdb   :  { %165 = vrot.lane.b32.xlu1 %v162_v5, %s442_s20 }
 0x145   :  { %v109_v10 = vpop.permute.xlu1 %108  ;;  %v164_v18 = vpop.permute.xlu0 %163 }
 0x149   :  { %v111_v12 = vpop.permute.xlu1 %110 }
 0x14a   :  { %v114_v13 = vsel %vm112_vm6, %v111_v12, %v109_v10  ;;  %v113_v14 = vsel %vm112_vm6, %v109_v10, %v111_v12 }
 0x14b   :  { %v115_v15 = vsel %vm63_vm7, %v114_v13, 0.0  ;;  %v140_v21 = vadd.f32 %v138_v4, %v113_v14 }
 0x14c   :  { %v139_v16 = vadd.f32 %v137_v3, %v115_v15 }
 0x14d   :  { %v166_v19 = vpop.permute.xlu1 %165 }
 0x14e   :  { %v168_v22 = vsel %vm167_vm8, %v164_v18, %v166_v19  ;;  %v169_v2 = vsel %vm167_vm8, %v166_v19, %v164_v18 }
 0x14f   :  { %v171_v23 = vsel %vm66_vm9, %v169_v2, 0.0  ;;  %v172_v24 = vadd.f32 %v168_v22, %v139_v16 }
 0x150   :  { %v173_v25 = vadd.f32 %v171_v23, %v140_v21 }
 0x151   :  { %v178_v26 = vadd.f32 %v176_v11, %v172_v24 }
 0x152   :  { %v179_v27 = vadd.f32 %v176_v11, %v173_v25 }
 0x153   :  { %v182_v28 = vmul.f32 0.044715, %v178_v26  ;;  %v180_v41 = vmul.f32 0.5, %v178_v26 }
 0x154   :  { %v183_v29 = vmul.f32 0.044715, %v179_v27  ;;  %v181_v39 = vmul.f32 0.5, %v179_v27 }
 0x155   :  { %v184_v30 = vmul.f32 %v182_v28, %v178_v26 }
 0x156   :  { %v185_v31 = vmul.f32 %v183_v29, %v179_v27  ;;  %v200_v45 = vpop.permute.xlu0 %199 }
 0x157   :  { %v186_v32 = vmul.f32 %v184_v30, %v178_v26 }
 0x158   :  { %v187_v33 = vmul.f32 %v185_v31, %v179_v27 }
 0x159   :  { %v188_v17 = vadd.f32 %v186_v32, %v178_v26 }
 0x15a   :  { %v189_v34 = vadd.f32 %v187_v33, %v179_v27 }
 0x15b   :  { %v190_v35 = vmul.f32 0.7978846, %v188_v17 }
 0x15c   :  { %v191_v20 = vmul.f32 0.7978846, %v189_v34 }
 0x15d   :  { %329 = vtanh.f32 %v190_v35 }
 0x15e   :  { %331 = vtanh.f32 %v191_v20 }
 0x167   :  { %v330_v36 = vpop.eup %329 }
 0x168   :  { %v332_v37 = vpop.eup %331  ;;  %v194_v38 = vadd.f32 1.0, %v330_v36 }
 0x169   :  { %v195_v40 = vadd.f32 1.0, %v332_v37 }
 0x16a   :  { %v196_v43 = vmul.f32 %v194_v38, %v180_v41 }
 0x16b   :  { %v197_v42 = vmul.f32 %v195_v40, %v181_v39 }
 0x16d   :  { %206 = vmatprep.subr.mxu0 %v197_v42 }
 0x16e   :  { %207 = vmatpush1.msra.mxu0 %v196_v43 }
 0x16f   :  { %297 = vmatmul.mubr.msk.f32.vlgmr.msra.gmra.mrb[0].mxu0 %vm202_vm10, %v53_v44 }
 0x242   :  { %v272_v46 = vpop.f32.mrb[0].mxu0 }
 0x243   :  { %v273_v47 = vadd.f32 %v272_v46, %v200_v45  ;;  %v274_v48 = vpop.f32.mrb[1].mxu0 }
 0x244   :  { %v275_v49 = vadd.f32 %v274_v48, %v200_v45 }
 0x245   :  { %v277_v50 = vadd.f32 %v273_v47, %v511_v7 }
 0x246   :  { %v278_v51 = vadd.f32 %v275_v49, %v515_v8 }
 0x247   :  { %279 = vst [vmem:[#allocation8] sm:$0xff] %v277_v50 }
 0x248   :  { %280 = vst [vmem:[#allocation8 + $0x8] sm:$0xff] %v278_v51 }
 0x249   :  { %410 = shalt.err (!%p407_p0)
}
 0x24a   :  { %s411_s27 = scalar_lea.hbm %s560_s3, 256 }
 0x24b   :  { %p412_p1 = scmp.ne.s32.totalorder %s560_s3, %s411_s27  ;;  %p415_p2 = scmp.lt.u32.totalorder %s411_s27, %s560_s3 }
 0x24d   :  { %p417_p3 = pnand %p415_p2, %p412_p1 }
 0x24f   :  { %420 = shalt.err (!%p417_p3)
}
 0x250   :  { %290 = dma.vmem_to_hbm [thread:$0]  %s288_s23, 256, %s560_s3, [#allocation4]  }
 0x251   :  { %425 = dma.done.wait [#allocation4], 256  }
 0x252   :  { %426 = vsyncadd [#allocation4], 4294967040 }
 0x253   :  { %294 = vsyncpa [#allocation3], 1 }
 0x254   :  { %295 = vsyncpa [#allocation6], 1 }
 0x255   :  { %296 = vsyncpa [#allocation4], 1 }

</bundles_post_ra>
